<compile_context>
chip_gen: v5e
topology: v5e:2x2
jax: 0.10.0
libtpu: 0.0.40
codegen_flags: <defaults>
</compile_context>

<pallas_src>
import math
import functools

import jax
import jax.numpy as jnp
import numpy as np
from jax.experimental import pallas as pl
from jax.experimental.pallas import tpu as pltpu


def _vmem_limit(block_bytes):
    # ~2x the double-buffered working set, clamped to a portable range
    # (v5e scoped default 16 MiB; v7x has only 64 MiB physical VMEM per TC).
    need = 4 * block_bytes
    return int(min(max(need, 4 * 2**20), 32 * 2**20))


# ----------------------------- dense projection ----------------------------- #

def _linear_kernel(x_ref, w_ref, b_ref, o_ref):
    # x_ref: (tm, F), w_ref: (F, O), b_ref: (1, O), o_ref: (tm, O)
    y = jnp.dot(x_ref[...], w_ref[...], preferred_element_type=jnp.float32)
    y = y + b_ref[...].astype(jnp.float32)
    o_ref[...] = y.astype(o_ref.dtype)


def pallas_linear(x2d, w, b, *, compute_dtype=jnp.float32, out_dtype=jnp.float32):
    """Row-tiled dense layer: (R, F) @ (F, O) + (O,) -> (R, O)."""
    R, F = x2d.shape
    O = w.shape[1]

    # Largest convenient row tile that divides R (falls back to a single block).
    tm = R
    for cand in (512, 256, 128, 64, 32, 16, 8):
        if R >= cand and R % cand == 0:
            tm = cand
            break

    xin = x2d.astype(compute_dtype)     # bf16 here halves activation DMA bytes
    win = w.astype(compute_dtype)       # bf16 here halves weight DMA bytes
    b2 = b.reshape(1, O).astype(jnp.float32)

    block_bytes = (tm * F + F * O + O + tm * O) * 4
    return pl.pallas_call(
        _linear_kernel,
        out_shape=jax.ShapeDtypeStruct((R, O), out_dtype),
        grid=(R // tm,),
        in_specs=[
            pl.BlockSpec((tm, F), lambda i: (i, 0)),
            pl.BlockSpec((F, O), lambda i: (0, 0)),
            pl.BlockSpec((1, O), lambda i: (0, 0)),
        ],
        out_specs=pl.BlockSpec((tm, O), lambda i: (i, 0)),
        compiler_params=pltpu.CompilerParams(
            dimension_semantics=("parallel",),
            vmem_limit_bytes=_vmem_limit(block_bytes)),
    )(xin, win, b2)


# ------------------------------ attention core ------------------------------ #

def _shaw_attn_kernel(q_ref, k_ref, v_ref, bias_ref, mask_ref, o_ref, *,
                      n_head, d_k, scale, compute_dtype):
    # q_ref: (1, T1, H*Dk), k_ref/v_ref: (1, T2, H*Dk),
    # bias_ref: (1, H, T1, T2), mask_ref: (1, Tm, T2), o_ref: (1, T1, H*Dk)
    q = q_ref[0]
    k = k_ref[0]
    v = v_ref[0]
    m = mask_ref[0]                                   # (Tm, T2)
    t1 = q.shape[0]
    t2 = k.shape[0]

    # Hoisted mask terms (shared by all heads): additive -1e30 bias avoids the
    # -inf -> NaN path; multiplicative re-zero matches the reference semantics
    # (fully-masked rows -> exactly 0).
    valid = jnp.broadcast_to(m != 0.0, (t1, t2))
    mask_bias = jnp.where(valid, jnp.float32(0.0), jnp.float32(-1e30))
    valid_f = valid.astype(jnp.float32)

    ctx_heads = []
    for h in range(n_head):
        sl = slice(h * d_k, (h + 1) * d_k)
        qh = q[:, sl].astype(compute_dtype)           # (T1, Dk)
        kh = k[:, sl].astype(compute_dtype)           # (T2, Dk)
        vh = v[:, sl].astype(compute_dtype)           # (T2, Dk)

        # content scores on the MXU, f32 accumulation
        scores = jnp.dot(qh, kh.T, preferred_element_type=jnp.float32)
        # add precomputed Shaw bias, scale, add mask bias
        scores = (scores + bias_ref[0, h]) * scale + mask_bias

        # softmax in f32 (VPU/EUP); reciprocal goes to the EUP slot
        s_max = jnp.max(scores, axis=-1, keepdims=True)
        p = jnp.exp(scores - s_max)
        denom = jnp.sum(p, axis=-1, keepdims=True)
        attn = p * pl.reciprocal(denom, approx=True)
        attn = attn * valid_f

        ctx = jnp.dot(attn.astype(compute_dtype), vh,
                      preferred_element_type=jnp.float32)   # (T1, Dk)
        ctx_heads.append(ctx)

    # single lane-dense store of the full (T1, H*Dk) context block
    o_ref[0] = jnp.concatenate(ctx_heads, axis=-1).astype(o_ref.dtype)


def pallas_shaw_attention(q, k, v, rel_bias, mask, *, n_head, d_k, scale,
                          compute_dtype=jnp.float32):
    """q: (B,T1,H*Dk), k/v: (B,T2,H*Dk), rel_bias: (B,H,T1,T2), mask: (B,Tm,T2)."""
    B, T1, HD = q.shape
    T2 = k.shape[1]
    Tm = mask.shape[1]
    assert Tm in (1, T1), "mask must be (B, 1, T2) or (B, T1, T2)"

    kern = functools.partial(_shaw_attn_kernel, n_head=n_head, d_k=d_k,
                             scale=scale, compute_dtype=compute_dtype)
    block_bytes = (2 * T1 * HD + 2 * T2 * HD + n_head * T1 * T2 + Tm * T2) * 4
    return pl.pallas_call(
        kern,
        out_shape=jax.ShapeDtypeStruct((B, T1, HD), jnp.float32),
        grid=(B,),
        in_specs=[
            pl.BlockSpec((1, T1, HD), lambda b: (b, 0, 0)),
            pl.BlockSpec((1, T2, HD), lambda b: (b, 0, 0)),
            pl.BlockSpec((1, T2, HD), lambda b: (b, 0, 0)),
            pl.BlockSpec((1, n_head, T1, T2), lambda b: (b, 0, 0, 0)),
            pl.BlockSpec((1, Tm, T2), lambda b: (b, 0, 0)),
        ],
        out_specs=pl.BlockSpec((1, T1, HD), lambda b: (b, 0, 0)),
        compiler_params=pltpu.CompilerParams(
            dimension_semantics=("parallel",),
            vmem_limit_bytes=_vmem_limit(block_bytes)),
    )(q, k, v, rel_bias, mask)


# ------------------------------ Module wrapper ------------------------------ #

class ShawRelPositionMHAPallas:
    """JAX/Pallas port of ShawRelPositionMultiHeadedAttention (eval mode)."""

    def __init__(self, n_head, n_feat, key, compute_dtype=jnp.float32):
        assert n_feat % n_head == 0
        self.h = n_head
        self.d_k = n_feat // n_head
        self.n_feat = n_feat
        self.compute_dtype = compute_dtype      # bf16 recommended on v6e/v7x
        self.max_right_rel_pos = 8
        self.max_left_rel_pos = 64
        n_rel = self.max_left_rel_pos + self.max_right_rel_pos + 1

        ks = jax.random.split(key, 9)
        lim = 1.0 / math.sqrt(n_feat)

        def lin(kw, kb, fan_in, fan_out):
            w = jax.random.uniform(kw, (fan_in, fan_out), jnp.float32, -lim, lim)
            b = jax.random.uniform(kb, (fan_out,), jnp.float32, -lim, lim)
            return w, b

        self.wq, self.bq = lin(ks[0], ks[1], n_feat, n_feat)
        self.wk, self.bk = lin(ks[2], ks[3], n_feat, n_feat)
        self.wv, self.bv = lin(ks[4], ks[5], n_feat, n_feat)
        self.wo, self.bo = lin(ks[6], ks[7], n_feat, n_feat)
        # torch.nn.Embedding default init: N(0, 1)
        self.rel_k_embed = jax.random.normal(ks[8], (n_rel, self.d_k), jnp.float32)

        # fused [Wq|Wk|Wv] projection for the self-attention path
        self.w_qkv = jnp.concatenate([self.wq, self.wk, self.wv], axis=1)
        self.b_qkv = jnp.concatenate([self.bq, self.bk, self.bv], axis=0)

    def _relative_indices(self, t2):
        idx = jnp.arange(t2)
        rel = idx[None, :] - idx[:, None]
        rel = jnp.clip(rel, -self.max_left_rel_pos, self.max_right_rel_pos)
        return rel + self.max_left_rel_pos

    def __call__(self, query, key, value, mask=None):
        B, T1, F = query.shape
        T2 = key.shape[1]
        cd = self.compute_dtype

        # projections (Pallas), kept in (B, T, H*Dk) layout — no head transposes.
        if (query is key) and (key is value):
            # fused QKV: input read from HBM once, MXU N-dim 3x wider.
            qkv = pallas_linear(query.reshape(B * T1, F), self.w_qkv, self.b_qkv,
                                compute_dtype=cd).reshape(B, T1, 3 * self.n_feat)
            q = qkv[..., :self.n_feat]
            k = qkv[..., self.n_feat:2 * self.n_feat]
            v = qkv[..., 2 * self.n_feat:]
        else:
            q = pallas_linear(query.reshape(B * T1, F), self.wq, self.bq,
                              compute_dtype=cd).reshape(B, T1, self.n_feat)
            k = pallas_linear(key.reshape(B * T2, F), self.wk, self.bk,
                              compute_dtype=cd).reshape(B, T2, self.n_feat)
            v = pallas_linear(value.reshape(B * T2, F), self.wv, self.bv,
                              compute_dtype=cd).reshape(B, T2, self.n_feat)

        # cache is only for API parity (head-first layout like the torch module);
        # the attention path itself never re-lays-out q/k/v.
        new_cache = (
            k.reshape(B, T2, self.h, self.d_k).transpose(0, 2, 1, 3),
            v.reshape(B, T2, self.h, self.d_k).transpose(0, 2, 1, 3),
        )

        # Shaw bias: compact q @ E^T on the MXU (glue XLA matmul), then expand
        # via the clipped relative-index gather. No (T1,T2,Dk) tensor anywhere.
        rel_idx = self._relative_indices(T2)[-T1:]                    # (T1, T2)
        q4 = q.reshape(B, T1, self.h, self.d_k)
        compact = jnp.einsum('blhd,pd->bhlp', q4, self.rel_k_embed)   # (B,H,T1,73)
        idx_b = jnp.broadcast_to(rel_idx[None, None, :, :], (B, self.h, T1, T2))
        rel_bias = jnp.take_along_axis(compact, idx_b, axis=-1)       # (B,H,T1,T2)

        if mask is None or mask.shape[-1] == 0:
            mask = jnp.ones((B, 1, T2), jnp.float32)   # fake mask -> all valid
        mask = mask.astype(jnp.float32)

        scale = 1.0 / math.sqrt(self.d_k)
        ctx = pallas_shaw_attention(q, k, v, rel_bias, mask,
                                    n_head=self.h, d_k=self.d_k, scale=scale,
                                    compute_dtype=cd)                 # (B,T1,H*Dk)

        out = pallas_linear(ctx.reshape(B * T1, self.h * self.d_k), self.wo,
                            self.bo, compute_dtype=cd).reshape(B, T1, self.n_feat)
        return out, new_cache


# ------------------------------ Reference (JAX) ----------------------------- #

def reference_forward(m, query, key, value, mask):
    q = query @ m.wq + m.bq
    k = key @ m.wk + m.bk
    v = value @ m.wv + m.bv
    B, T1, _ = query.shape
    T2 = key.shape[1]
    q = q.reshape(B, T1, m.h, m.d_k).transpose(0, 2, 1, 3)
    k = k.reshape(B, T2, m.h, m.d_k).transpose(0, 2, 1, 3)
    v = v.reshape(B, T2, m.h, m.d_k).transpose(0, 2, 1, 3)
    rel_idx = m._relative_indices(T2)
    rel_k = m.rel_k_embed[rel_idx][-T1:]
    rel_att = jnp.einsum('bhld,lrd->bhlr', q, rel_k)
    scores = (jnp.einsum('bhld,bhrd->bhlr', q, k) + rel_att) / math.sqrt(m.d_k)
    valid = (mask[:, None, :, :] != 0)
    scores = jnp.where(valid, scores, -jnp.inf)
    attn = jax.nn.softmax(scores, axis=-1)
    attn = jnp.where(valid, attn, 0.0)
    ctx = jnp.einsum('bhlr,bhrd->bhld', attn, v)
    x = ctx.transpose(0, 2, 1, 3).reshape(B, T1, m.h * m.d_k)
    return x @ m.wo + m.bo


# ---------------------------------- main ------------------------------------ #

if __name__ == "__main__":
    key = jax.random.PRNGKey(0)
    k_param, k_x, k_k, k_v = jax.random.split(key, 4)

    B, T, n_feat, n_head = 2, 8, 32, 4

    module = ShawRelPositionMHAPallas(n_head, n_feat, k_param)

    x = jax.random.normal(k_x, (B, T, n_feat), jnp.float32)

    # (B, 1, T2) padding mask: batch 0 fully valid, batch 1 has 2 padded frames.
    mask = jnp.stack([
        jnp.ones((1, T), jnp.float32),
        jnp.concatenate([jnp.ones((1, T - 2)), jnp.zeros((1, 2))], axis=-1),
    ], axis=0)

    # 1) self-attention (fused QKV path), f32 MXU inputs
    out, (kc, vc) = module(x, x, x, mask)
    out = jax.block_until_ready(out)
    ref = reference_forward(module, x, x, x, mask)
    np.testing.assert_allclose(np.asarray(out), np.asarray(ref),
                               rtol=5e-3, atol=5e-3)
    assert out.shape == (B, T, n_feat)
    assert kc.shape == (B, n_head, T, n_feat // n_head)

    # 2) cross-attention (separate projections fallback path)
    keyx = jax.random.normal(k_k, (B, T, n_feat), jnp.float32)
    valx = jax.random.normal(k_v, (B, T, n_feat), jnp.float32)
    out2, _ = module(x, keyx, valx, mask)
    out2 = jax.block_until_ready(out2)
    ref2 = reference_forward(module, x, keyx, valx, mask)
    np.testing.assert_allclose(np.asarray(out2), np.asarray(ref2),
                               rtol=5e-3, atol=5e-3)

    # 3) bf16-MXU-input variant (recommended on v6e/v7x), looser tolerance
    module_bf16 = ShawRelPositionMHAPallas(n_head, n_feat, k_param,
                                           compute_dtype=jnp.bfloat16)
    out3, _ = module_bf16(x, x, x, mask)
    out3 = jax.block_until_ready(out3)
    np.testing.assert_allclose(np.asarray(out3), np.asarray(ref),
                               rtol=1e-1, atol=1e-1)

    print("KERNEL_OK")
</pallas_src>

<mosaic_0001>
module attributes {stable_mosaic.version = 11 : i64} {
  func.func @_linear_kernel(%arg0: i32, %arg1: memref<16x32xf32, #tpu.memory_space<vmem>>, %arg2: memref<32x96xf32, #tpu.memory_space<vmem>>, %arg3: memref<1x96xf32, #tpu.memory_space<vmem>>, %arg4: memref<16x96xf32, #tpu.memory_space<vmem>>) attributes {dimension_semantics = [#tpu.dimension_semantics<parallel>], iteration_bounds = array<i64: 1>, scalar_prefetch = 0 : i64, scratch_operands = 0 : i64, tpu.core_type = #tpu.core_type<tc>, window_params = [{transform_indices = @transform_0, window_bounds = array<i64: 16, 32>}, {pipeline_mode = #tpu.pipeline_mode<synchronous>, transform_indices = @transform_1, window_bounds = array<i64: 32, 96>}, {pipeline_mode = #tpu.pipeline_mode<synchronous>, transform_indices = @transform_2, window_bounds = array<i64: 1, 96>}, {transform_indices = @transform_3, window_bounds = array<i64: 16, 96>}]} {
    %c0 = arith.constant 0 : index
    %c0_0 = arith.constant 0 : index
    %0 = vector.load %arg1[%c0, %c0_0] : memref<16x32xf32, #tpu.memory_space<vmem>>, vector<16x32xf32>
    %c0_1 = arith.constant 0 : index
    %c0_2 = arith.constant 0 : index
    %1 = vector.load %arg2[%c0_1, %c0_2] : memref<32x96xf32, #tpu.memory_space<vmem>>, vector<32x96xf32>
    %cst = arith.constant dense<0.000000e+00> : vector<16x96xf32>
    %2 = tpu.matmul %0, %1, %cst {dimension_numbers = #tpu.dot_dimension_numbers<[1], [0], [0], [1], [0, 0, 1, 1], [], []>} : vector<16x32xf32>, vector<32x96xf32>, vector<16x96xf32> -> vector<16x96xf32>
    %c0_3 = arith.constant 0 : index
    %c0_4 = arith.constant 0 : index
    %3 = vector.load %arg3[%c0_3, %c0_4] : memref<1x96xf32, #tpu.memory_space<vmem>>, vector<1x96xf32>
    %4 = vector.broadcast %3 : vector<1x96xf32> to vector<16x96xf32>
    %5 = arith.addf %2, %4 : vector<16x96xf32>
    %c0_5 = arith.constant 0 : index
    %c0_6 = arith.constant 0 : index
    %6 = vector.load %arg4[%c0_5, %c0_6] : memref<16x96xf32, #tpu.memory_space<vmem>>, vector<16x96xf32>
    tpu.vector_store %arg4[%c0_5, %c0_6], %5 {strides = array<i32>} : memref<16x96xf32, #tpu.memory_space<vmem>>, vector<16x96xf32>,
    return
  }
  func.func @transform_0(%arg0: i32) -> (i32, i32) {
    %c0_i32 = arith.constant 0 : i32
    %c0_i32_0 = arith.constant 0 : i32
    return %arg0, %c0_i32 : i32, i32
  }
  func.func @transform_1(%arg0: i32) -> (i32, i32) {
    %c0_i32 = arith.constant 0 : i32
    %c0_i32_0 = arith.constant 0 : i32
    %c0_i32_1 = arith.constant 0 : i32
    return %c0_i32, %c0_i32_0 : i32, i32
  }
  func.func @transform_2(%arg0: i32) -> (i32, i32) {
    %c0_i32 = arith.constant 0 : i32
    %c0_i32_0 = arith.constant 0 : i32
    %c0_i32_1 = arith.constant 0 : i32
    return %c0_i32, %c0_i32_0 : i32, i32
  }
  func.func @transform_3(%arg0: i32) -> (i32, i32) {
    %c0_i32 = arith.constant 0 : i32
    %c0_i32_0 = arith.constant 0 : i32
    return %arg0, %c0_i32 : i32, i32
  }
}

</mosaic_0001>

<bundles_post_ra>
// kernel: tpu_custom_call.1
= control target key start
LH: loop header
LB: loop body
LE: loop exit
PB: predicated region body
PF: predicated region fallthrough
CT: control target
= control target key end

     0   :  { %8 = vsyncpa [#allocation3], 0  ;;  %s246_s0 = inlined_call_operand.hbm [shape: f32[16,32], index: 0, kind: input, shape index: {}]   ;;  %s247_s1 = inlined_call_operand.hbm [shape: f32[32,96], index: 1, kind: input, shape index: {}]   ;;  %s248_s2 = inlined_call_operand.vmem [shape: f32[1,96], index: 2, kind: input, shape index: {}]   ;;  %s249_s3 = inlined_call_operand.hbm [shape: f32[16,96], index: 3, kind: output, shape index: {}]  }
   0x1   :  { %9 = vsyncpa [#allocation6], 0 }
   0x2   :  { %10 = vsyncpa [#allocation4], 0  ;;  %s15_s14 = sshll.u32 %s246_s0, 4  ;;  %s200_s15 = smov [#allocation2]   ;;  %s16_s14 = int_to_ptr.hbm [resolvable:$true] %s15_s14 }
   0x3   :  { %s17_s16 = sshll.u32 %s200_s15, 4  ;;  %s28_s19 = sshll.u32 %s247_s1, 4  ;;  %s18_s16 = int_to_ptr.vmem [resolvable:$true] %s17_s16  ;;  %s29_s19 = int_to_ptr.hbm [resolvable:$true] %s28_s19 }
   0x4   :  { %s201_s20 = smov 128   ;;  %s202_s21 = smov 8  }
   0x5   :  { %23 = dma.hbm_to_vmem [thread:$0]  %s16_s14, 256, %s18_s16, [#allocation3], %s201_s20, %s201_s20, %s202_s21  }
   0x6   :  { %s203_s22 = smov [#allocation5]  }
   0x7   :  { %s30_s23 = sshll.u32 %s203_s22, 4  ;;  %s31_s23 = int_to_ptr.vmem [resolvable:$true] %s30_s23 }
   0x8   :  { %36 = dma.hbm_to_vmem [thread:$0]  %s29_s19, 512, %s31_s23, [#allocation6], %s201_s20, %s201_s20, %s202_s21  }
   0x9   :  { %194 = dma.done.wait [#allocation3], 256  }
   0xa   :  { %195 = vsyncadd [#allocation3], 4294967040 }
   0xb   :  { %196 = dma.done.wait [#allocation6], 512  }
   0xc   :  { %197 = vsyncadd [#allocation6], 4294966784  ;;  %v52_v0 = vld [vmem:[#allocation5 + $0x18] sm:$0xff]  ;;  %v51_v1 = vld [vmem:[#allocation5 + $0x10] sm:$0xff]  ;;  %vm57_vm0 = vcmask 261120   ;;  %s204_s24 = smov [#allocation7]  }
   0xd   :  { %76 = vmatpush.msra.mxu0 %v52_v0  ;;  %112 = vmatpush.msra.mxu1 %v52_v0  ;;  %v50_v2 = vld [vmem:[#allocation5 + $0x8] sm:$0xff]  ;;  %v49_v3 = vld [vmem:[#allocation5] sm:$0xff]  ;;  %v47_v4 = vld [vmem:[#allocation2] sm:$0xff]  ;;  %s94_s25 = sshll.u32 %s204_s24, 4  ;;  %s96_s28 = sshll.u32 %s249_s3, 4  ;;  %vm87_vm1 = vcmask 785408   ;;  %s95_s25 = int_to_ptr.vmem [resolvable:$true] %s94_s25  ;;  %s97_s28 = int_to_ptr.hbm [resolvable:$true] %s96_s28 }
   0xe   :  { %v48_v5 = vld [vmem:[#allocation2 + $0x8] sm:$0xff]  ;;  %v121_v6 = vld [vmem:[%s248_s2] ss:$0 sm:$0xff] }
   0xf   :  { %77 = vmatpush.msra.mxu0 %v51_v1  ;;  %113 = vmatpush.msra.mxu1 %v51_v1 }
  0x11   :  { %78 = vmatpush.msra.mxu0 %v50_v2  ;;  %114 = vmatpush.msra.mxu1 %v50_v2 }
  0x13   :  { %79 = vmatpush.msra.mxu0 %v49_v3  ;;  %115 = vmatpush.msra.mxu1 %v49_v3 }
  0x14   :  { %110 = vmatmul.msk.f32.vlgmr.msra.gmra.mxu0 %vm57_vm0, %v47_v4  ;;  %111 = vmatmul.msk.f32.vlgmr.msra.gmra.mxu1 %vm57_vm0, %v48_v5 }
  0x91   :  { %v81_v7 = vpop.f32.mrf.mxu0  ;;  %v84_v8 = vpop.f32.mrf.mxu1 }
  0x92   :  { %v82_v9 = vadd.f32 %v121_v6, %v81_v7  ;;  %v85_v10 = vadd.f32 %v121_v6, %v84_v8 }
  0x94   :  { %88 = vst.msk [vmem:[#allocation7] sm:$0xff] %vm87_vm1, %v82_v9 }
  0x95   :  { %89 = vst.msk [vmem:[#allocation7 + $0x8] sm:$0xff] %vm87_vm1, %v85_v10 }
  0x96   :  { %102 = dma.vmem_to_hbm [thread:$0]  %s95_s25, 256, %s97_s28, [#allocation4], %s201_s20, %s201_s20, %s202_s21  }
  0x97   :  { %198 = dma.done.wait [#allocation4], 256  }
  0x98   :  { %199 = vsyncadd [#allocation4], 4294967040 }
  0x99   :  { %107 = vsyncpa [#allocation3], 1 }
  0x9a   :  { %108 = vsyncpa [#allocation6], 1 }
  0x9b   :  { %109 = vsyncpa [#allocation4], 1 }

</bundles_post_ra>
